<compile_context>
chip_gen: v7x
topology: tpu7x:2x2x1
jax: 0.10.0
libtpu: 0.0.40
codegen_flags: <defaults>
</compile_context>

<pallas_src>
import math

import jax
import jax.numpy as jnp
from jax.experimental import pallas as pl
from jax.experimental.pallas import tpu as pltpu


# ----------------------------- toy model config ------------------------------
FEATURE_DIM = 32          # d_model (must be divisible by NUM_HEADS)
ROBERTA_DIM = 48
SENTENCE_DIM = 40
NUM_CLASSES = 7
NUM_HEADS = 8
HEAD_DIM = FEATURE_DIM // NUM_HEADS
SEQ = 3                   # stack of [visual, roberta_proj, sentence_proj]
DIM_FF = 2048             # nn.TransformerEncoderLayer default dim_feedforward
NUM_LAYERS = 2
LN_EPS = 1e-5
BATCH = 2

assert FEATURE_DIM % NUM_HEADS == 0


# ------------------------------ shared helpers --------------------------------
def _layernorm(x, gamma, beta, eps=LN_EPS):
    mu = jnp.mean(x, axis=-1, keepdims=True)
    var = jnp.mean((x - mu) * (x - mu), axis=-1, keepdims=True)
    return (x - mu) * jax.lax.rsqrt(var + eps) * gamma + beta


def _gelu(x):
    # TODO(synk): PyTorch nn.GELU()/F.gelu default is the exact erf form; the tanh
    # approximation is used here (EUP-friendly, max abs deviation ~1e-3).
    c = math.sqrt(2.0 / math.pi)
    return 0.5 * x * (1.0 + jnp.tanh(c * (x + 0.044715 * x * x * x)))


def make_positional_encoding(d_model: int, max_len: int) -> jnp.ndarray:
    """Sin/cos table matching PositionalEncoding.__init__ (handles odd d_model too)."""
    position = jnp.arange(max_len, dtype=jnp.float32)[:, None]
    div_term = jnp.exp(jnp.arange(0, d_model, 2, dtype=jnp.float32)
                       * (-math.log(10000.0) / d_model))
    angles = position * div_term                                   # [max_len, ceil(d/2)]
    pe = jnp.zeros((max_len, d_model), dtype=jnp.float32)
    pe = pe.at[:, 0::2].set(jnp.sin(angles))
    pe = pe.at[:, 1::2].set(jnp.cos(angles[:, : d_model // 2]))
    return pe


# ------------------------- pallas_call plumbing helper -------------------------
_VMEM = pl.BlockSpec(memory_space=pltpu.MemorySpace.VMEM)


def _call(kernel, out_shape, *args):
    """Grid-free pallas_call: every operand is a whole-array VMEM block."""
    return pl.pallas_call(
        kernel,
        out_shape=out_shape,
        in_specs=[_VMEM] * len(args),
        out_specs=_VMEM,
    )(*args)


# ---------------------------------- kernels ------------------------------------
def _linear_kernel(x_ref, w_ref, b_ref, o_ref):
    o_ref[...] = (jnp.dot(x_ref[...], w_ref[...],
                          preferred_element_type=jnp.float32) + b_ref[...])


def _linear_ln_gelu_kernel(x_ref, w_ref, b_ref, g_ref, be_ref, o_ref):
    y = jnp.dot(x_ref[...], w_ref[...], preferred_element_type=jnp.float32) + b_ref[...]
    y = _layernorm(y, g_ref[...], be_ref[...])
    o_ref[...] = _gelu(y)


def _embed_pe_kernel(v_ref, r_ref, s_ref, pe_ref, o_ref):
    """Stack the three modality tokens into [S,B,F] and add the positional encoding."""
    tokens = (v_ref[...], r_ref[...], s_ref[...])
    for idx, tok in enumerate(tokens):
        o_ref[idx] = tok + pe_ref[idx:idx + 1, :]


def _fusion_first_kernel(v_ref, r_ref, s_ref, wv_ref, wr_ref, ws_ref,
                         b_ref, g_ref, be_ref, o_ref):
    """fusion[0:3] = GELU(LN(Linear(cat([v, rp, sp])))); the concat is folded into
    three partial matmuls (weight split done in the wrapper)."""
    y = (jnp.dot(v_ref[...], wv_ref[...], preferred_element_type=jnp.float32)
         + jnp.dot(r_ref[...], wr_ref[...], preferred_element_type=jnp.float32)
         + jnp.dot(s_ref[...], ws_ref[...], preferred_element_type=jnp.float32)
         + b_ref[...])
    y = _layernorm(y, g_ref[...], be_ref[...])
    o_ref[...] = _gelu(y)


def _encoder_layer_kernel(x_ref, wq_ref, wk_ref, wv_ref, wo_ref,
                          bq_ref, bk_ref, bv_ref, bo_ref,
                          hsel_ref, hselt_ref,
                          g1_ref, be1_ref,
                          w1_ref, b1_ref, w2_ref, b2_ref,
                          g2_ref, be2_ref,
                          o_ref):
    """One post-norm nn.TransformerEncoderLayer (gelu activation, eval mode) on [S,B,F]."""
    seq = x_ref.shape[0]
    scale = 1.0 / math.sqrt(HEAD_DIM)

    wq, wk, wv, wo = wq_ref[...], wk_ref[...], wv_ref[...], wo_ref[...]
    bq, bk, bv, bo = bq_ref[...], bk_ref[...], bv_ref[...], bo_ref[...]
    hsel, hselt = hsel_ref[...], hselt_ref[...]          # [F,H] / [H,F] head selectors

    xs = [x_ref[s] for s in range(seq)]                                   # [B,F] each
    qs = [jnp.dot(t, wq, preferred_element_type=jnp.float32) + bq for t in xs]
    ks = [jnp.dot(t, wk, preferred_element_type=jnp.float32) + bk for t in xs]
    vs = [jnp.dot(t, wv, preferred_element_type=jnp.float32) + bv for t in xs]

    for i in range(seq):
        # Per-head scores vs every key position via block-diagonal selector matmul
        # (no reshape/transpose of the lane dimension inside the kernel).
        sc = [scale * jnp.dot(qs[i] * ks[j], hsel,
                              preferred_element_type=jnp.float32)          # [B,H]
              for j in range(seq)]
        m = sc[0]
        for j in range(1, seq):
            m = jnp.maximum(m, sc[j])
        es = [jnp.exp(s_ - m) for s_ in sc]
        den = es[0]
        for j in range(1, seq):
            den = den + es[j]
        inv = 1.0 / den                                                    # [B,H]

        ctx = None
        for j in range(seq):
            pj = jnp.dot(es[j] * inv, hselt,
                         preferred_element_type=jnp.float32)               # [B,F]
            term = pj * vs[j]
            ctx = term if ctx is None else ctx + term
        attn = jnp.dot(ctx, wo, preferred_element_type=jnp.float32) + bo   # [B,F]

        h = _layernorm(xs[i] + attn, g1_ref[...], be1_ref[...])            # add & norm1
        ff = _gelu(jnp.dot(h, w1_ref[...],
                           preferred_element_type=jnp.float32) + b1_ref[...])
        ff = jnp.dot(ff, w2_ref[...], preferred_element_type=jnp.float32) + b2_ref[...]
        o_ref[i] = _layernorm(h + ff, g2_ref[...], be2_ref[...])           # add & norm2


def _merge_kernel(x_ref, fused_ref, tg_ref, tb_ref, og_ref, ob_ref, o_ref):
    """Final encoder LayerNorm, mean over the 3 tokens, add fusion branch, output_norm."""
    seq = x_ref.shape[0]
    acc = _layernorm(x_ref[0], tg_ref[...], tb_ref[...])
    for s in range(1, seq):
        acc = acc + _layernorm(x_ref[s], tg_ref[...], tb_ref[...])
    agg = acc * (1.0 / seq)
    o_ref[...] = _layernorm(fused_ref[...] + agg, og_ref[...], ob_ref[...])


# ------------------------------- kernel wrappers --------------------------------
def linear(x, w, b):
    out = jax.ShapeDtypeStruct((x.shape[0], w.shape[1]), jnp.float32)
    return _call(_linear_kernel, out, x, w, b)


def linear_ln_gelu(x, w, b, g, beta):
    out = jax.ShapeDtypeStruct((x.shape[0], w.shape[1]), jnp.float32)
    return _call(_linear_ln_gelu_kernel, out, x, w, b, g, beta)


def enhanced_classification_head_forward(params, visual, roberta_emb, sentence_emb):
    B = visual.shape[0]
    F = FEATURE_DIM
    assert params["pe"].shape[0] >= SEQ, "positional-encoding table shorter than sequence"

    # ---- EnhancedAttributeModule ----
    rp = linear(roberta_emb, params["wr"], params["br"])          # [B,F]
    sp = linear(sentence_emb, params["ws"], params["bs"])         # [B,F]

    emb = _call(_embed_pe_kernel,
                jax.ShapeDtypeStruct((SEQ, B, F), jnp.float32),
                visual, rp, sp, params["pe"])                     # [S,B,F]

    x = emb
    for lp in params["layers"]:
        x = _call(_encoder_layer_kernel,
                  jax.ShapeDtypeStruct((SEQ, B, F), jnp.float32),
                  x, lp["wq"], lp["wk"], lp["wv"], lp["wo"],
                  lp["bq"], lp["bk"], lp["bv"], lp["bo"],
                  params["hsel"], params["hselt"],
                  lp["g1"], lp["be1"],
                  lp["w1"], lp["b1"], lp["w2"], lp["b2"],
                  lp["g2"], lp["be2"])

    # fusion branch: Linear(3F,F) on cat([v, rp, sp]) == sum of three partial matmuls
    wf1 = params["wf1"]
    f1 = _call(_fusion_first_kernel,
               jax.ShapeDtypeStruct((B, F), jnp.float32),
               visual, rp, sp,
               wf1[:F], wf1[F:2 * F], wf1[2 * F:],
               params["bf1"], params["fg"], params["fb"])         # [B,F]
    fused = linear(f1, params["wf2"], params["bf2"])              # [B,F]

    merged = _call(_merge_kernel,
                   jax.ShapeDtypeStruct((B, F), jnp.float32),
                   x, fused, params["tg"], params["tb"], params["og"], params["ob"])

    # ---- classifier ----
    c1 = linear_ln_gelu(merged, params["wc1"], params["bc1"], params["cg1"], params["cb1"])
    c2 = linear_ln_gelu(c1, params["wc2"], params["bc2"], params["cg2"], params["cb2"])
    logits = linear(c2, params["wc3"], params["bc3"])             # [B, NUM_CLASSES]
    # TODO(synk): dropout layers are eval-mode identities; no RNG dropout kernel emitted.
    return logits


# ------------------------------ parameter init ----------------------------------
def init_params(key):
    it = iter(jax.random.split(key, 96))

    def mat(din, dout, scale=0.1):
        return scale * jax.random.normal(next(it), (din, dout), dtype=jnp.float32)

    def vec(d, scale=0.05):
        return scale * jax.random.normal(next(it), (1, d), dtype=jnp.float32)

    def ln(d):
        g = 1.0 + 0.05 * jax.random.normal(next(it), (1, d), dtype=jnp.float32)
        b = 0.05 * jax.random.normal(next(it), (1, d), dtype=jnp.float32)
        return g, b

    F = FEATURE_DIM
    params = {
        "wr": mat(ROBERTA_DIM, F), "br": vec(F),
        "ws": mat(SENTENCE_DIM, F), "bs": vec(F),
        "pe": make_positional_encoding(F, max_len=SEQ),
    }
    layers = []
    for _ in range(NUM_LAYERS):
        g1, be1 = ln(F)
        g2, be2 = ln(F)
        layers.append({
            "wq": mat(F, F), "wk": mat(F, F), "wv": mat(F, F), "wo": mat(F, F),
            "bq": vec(F), "bk": vec(F), "bv": vec(F), "bo": vec(F),
            "g1": g1, "be1": be1,
            "w1": mat(F, DIM_FF), "b1": vec(DIM_FF),
            "w2": mat(DIM_FF, F), "b2": vec(F),
            "g2": g2, "be2": be2,
        })
    params["layers"] = layers
    params["tg"], params["tb"] = ln(F)                 # UnifiedMultiModalTransformer.norm
    params["wf1"] = mat(3 * F, F); params["bf1"] = vec(F)
    params["fg"], params["fb"] = ln(F)
    params["wf2"] = mat(F, F); params["bf2"] = vec(F)
    params["og"], params["ob"] = ln(F)                 # output_norm
    params["wc1"] = mat(F, F); params["bc1"] = vec(F)
    params["cg1"], params["cb1"] = ln(F)
    params["wc2"] = mat(F, F // 2); params["bc2"] = vec(F // 2)
    params["cg2"], params["cb2"] = ln(F // 2)
    params["wc3"] = mat(F // 2, NUM_CLASSES); params["bc3"] = vec(NUM_CLASSES)

    # one-hot feature-channel -> attention-head selector (head-major layout, f // HEAD_DIM)
    head_id = jnp.arange(F, dtype=jnp.int32) // HEAD_DIM
    hsel = (head_id[:, None] == jnp.arange(NUM_HEADS, dtype=jnp.int32)[None, :]
            ).astype(jnp.float32)
    params["hsel"] = hsel           # [F, H]
    params["hselt"] = hsel.T        # [H, F]
    return params


# ------------------------- pure-JAX reference (no Pallas) ------------------------
def reference_forward(params, visual, roberta_emb, sentence_emb):
    P = jax.lax.Precision.HIGHEST

    def dot(a, b):
        return jnp.dot(a, b, precision=P)

    def ln(x, g, b):
        mu = jnp.mean(x, axis=-1, keepdims=True)
        var = jnp.mean((x - mu) ** 2, axis=-1, keepdims=True)
        return (x - mu) / jnp.sqrt(var + LN_EPS) * g + b

    F = FEATURE_DIM
    rp = dot(roberta_emb, params["wr"]) + params["br"]
    sp = dot(sentence_emb, params["ws"]) + params["bs"]
    emb = jnp.stack([visual, rp, sp], axis=1) + params["pe"][None, :SEQ, :]   # [B,S,F]
    x = jnp.transpose(emb, (1, 0, 2))                                         # [S,B,F]

    for lp in params["layers"]:
        q = dot(x, lp["wq"]) + lp["bq"]
        k = dot(x, lp["wk"]) + lp["bk"]
        v = dot(x, lp["wv"]) + lp["bv"]

        def heads(t):   # [S,B,F] -> [B,H,S,Dh]
            return jnp.transpose(t.reshape(SEQ, -1, NUM_HEADS, HEAD_DIM), (1, 2, 0, 3))

        qh, kh, vh = heads(q), heads(k), heads(v)
        sc = jnp.einsum("bhqd,bhkd->bhqk", qh, kh, precision=P) / math.sqrt(HEAD_DIM)
        w = jax.nn.softmax(sc, axis=-1)
        oh = jnp.einsum("bhqk,bhkd->bhqd", w, vh, precision=P)
        attn = jnp.transpose(oh, (2, 0, 1, 3)).reshape(SEQ, -1, F)
        attn = dot(attn, lp["wo"]) + lp["bo"]
        h = ln(x + attn, lp["g1"], lp["be1"])
        ff = dot(_gelu(dot(h, lp["w1"]) + lp["b1"]), lp["w2"]) + lp["b2"]
        x = ln(h + ff, lp["g2"], lp["be2"])

    x = ln(x, params["tg"], params["tb"])
    transformed = jnp.transpose(x, (1, 0, 2))          # [B,S,F]
    aggregated = jnp.mean(transformed, axis=1)         # [B,F]

    cat = jnp.concatenate([visual, rp, sp], axis=-1)
    f1 = _gelu(ln(dot(cat, params["wf1"]) + params["bf1"], params["fg"], params["fb"]))
    fused = dot(f1, params["wf2"]) + params["bf2"]
    out = ln(fused + aggregated, params["og"], params["ob"])

    c1 = _gelu(ln(dot(out, params["wc1"]) + params["bc1"], params["cg1"], params["cb1"]))
    c2 = _gelu(ln(dot(c1, params["wc2"]) + params["bc2"], params["cg2"], params["cb2"]))
    return dot(c2, params["wc3"]) + params["bc3"]


# ------------------------------------- main --------------------------------------
if __name__ == "__main__":
    key = jax.random.PRNGKey(0)
    k_params, k_vis, k_rob, k_sen = jax.random.split(key, 4)

    params = init_params(k_params)
    visual = jax.random.normal(k_vis, (BATCH, FEATURE_DIM), dtype=jnp.float32)
    roberta_emb = jax.random.normal(k_rob, (BATCH, ROBERTA_DIM), dtype=jnp.float32)
    sentence_emb = jax.random.normal(k_sen, (BATCH, SENTENCE_DIM), dtype=jnp.float32)

    logits = enhanced_classification_head_forward(params, visual, roberta_emb, sentence_emb)
    logits = jax.block_until_ready(logits)

    ref = reference_forward(params, visual, roberta_emb, sentence_emb)
    assert logits.shape == (BATCH, NUM_CLASSES)
    max_diff = float(jnp.max(jnp.abs(logits - ref)))
    assert jnp.allclose(logits, ref, atol=3e-2, rtol=3e-2), (
        f"mismatch vs reference, max abs diff = {max_diff}")

    print("KERNEL_OK")
</pallas_src>

<mosaic_0001>
module attributes {stable_mosaic.version = 11 : i64} {
  func.func @_linear_kernel(%arg0: memref<2x48xf32, #tpu.memory_space<vmem>>, %arg1: memref<48x32xf32, #tpu.memory_space<vmem>>, %arg2: memref<1x32xf32, #tpu.memory_space<vmem>>, %arg3: memref<2x32xf32, #tpu.memory_space<vmem>>) attributes {dimension_semantics = [], scalar_prefetch = 0 : i64, scratch_operands = 0 : i64, tpu.core_type = #tpu.core_type<tc>} {
    %c0 = arith.constant 0 : index
    %c0_0 = arith.constant 0 : index
    %0 = vector.load %arg0[%c0, %c0_0] : memref<2x48xf32, #tpu.memory_space<vmem>>, vector<2x48xf32>
    %c0_1 = arith.constant 0 : index
    %c0_2 = arith.constant 0 : index
    %1 = vector.load %arg1[%c0_1, %c0_2] : memref<48x32xf32, #tpu.memory_space<vmem>>, vector<48x32xf32>
    %cst = arith.constant dense<0.000000e+00> : vector<2x32xf32>
    %2 = tpu.matmul %0, %1, %cst {dimension_numbers = #tpu.dot_dimension_numbers<[1], [0], [0], [1], [0, 0, 1, 1], [], []>} : vector<2x48xf32>, vector<48x32xf32>, vector<2x32xf32> -> vector<2x32xf32>
    %c0_3 = arith.constant 0 : index
    %c0_4 = arith.constant 0 : index
    %3 = vector.load %arg2[%c0_3, %c0_4] : memref<1x32xf32, #tpu.memory_space<vmem>>, vector<1x32xf32>
    %4 = vector.broadcast %3 : vector<1x32xf32> to vector<2x32xf32>
    %5 = arith.addf %2, %4 : vector<2x32xf32>
    %c0_5 = arith.constant 0 : index
    %c0_6 = arith.constant 0 : index
    %6 = vector.load %arg3[%c0_5, %c0_6] : memref<2x32xf32, #tpu.memory_space<vmem>>, vector<2x32xf32>
    tpu.vector_store %arg3[%c0_5, %c0_6], %5 {strides = array<i32>} : memref<2x32xf32, #tpu.memory_space<vmem>>, vector<2x32xf32>,
    return
  }
}

</mosaic_0001>

<bundles_post_ra>
// kernel: tpu_custom_call.1
= control target key start
LH: loop header
LB: loop body
LE: loop exit
PB: predicated region body
PF: predicated region fallthrough
CT: control target
= control target key end

     0   :  { %v180_v3 = vmov 0.0|0.0   ;;  %vm181_vm0 = vmmov 0   ;;  %v182_v6 = vmov 0.0   ;;  %s240_s0 = inlined_call_operand.vmem [shape: f32[2,48], index: 0, kind: input, shape index: {}]   ;;  %s241_s1 = inlined_call_operand.vmem [shape: f32[48,32], index: 1, kind: input, shape index: {}]   ;;  %s242_s2 = inlined_call_operand.vmem [shape: f32[1,32], index: 2, kind: input, shape index: {}]   ;;  %s243_s3 = inlined_call_operand.hbm [shape: f32[2,32], index: 3, kind: output, shape index: {}]  }
   0x1   :  { %v16_v0 = vld [vmem:[%s241_s1] sm:$0xff]  ;;  %v17_v1 = vld [vmem:[%s241_s1 + $0x8] sm:$0xff]  ;;  %v18_v2 = vld [vmem:[%s241_s1 + $0x10] sm:$0xff]  ;;  %143 = vmatprep.subr.bf16.mxu0 %v180_v3  ;;  %140 = vmatprep.mubr.msk.f32.mxu0 %vm181_vm0, %v182_v6 }
   0x2   :  { %v144_v4 = vpack.c.bf16 %v17_v1, %v16_v0  ;;  %v19_v5 = vld [vmem:[%s241_s1 + $0x18] sm:$0xff] }
   0x3   :  { %8 = vsyncpa [#allocation3], 0  ;;  %v147_v7 = vpack.c.bf16 %v19_v5, %v18_v2  ;;  %v20_v8 = vld [vmem:[%s241_s1 + $0x20] sm:$0xff]  ;;  %v21_v9 = vld [vmem:[%s241_s1 + $0x28] sm:$0xff]  ;;  %vm29_vm1 = vcmask 392192   ;;  %s183_s28 = smov [#allocation2]  }
   0x4   :  { %145 = vmatpush3.bf16.msra.mxu0 %v144_v4  ;;  %v150_v10 = vpack.c.bf16 %v21_v9, %v20_v8  ;;  %v15_v11 = vld [vmem:[%s240_s0] sm:$0x3]  ;;  %s111_s29 = sshll.u32 %s183_s28, 4  ;;  %vm103_vm2 = vcmask 254976   ;;  %s112_s29 = int_to_ptr.vmem [resolvable:$true] %s111_s29 }
   0x5   :  { %146 = vmatprep.subr.bf16.mxu0 %v180_v3  ;;  %v119_v12 = vld [vmem:[%s242_s2] ss:$0 sm:$0xff]  ;;  %s156_s1 = scalar_lea.vmem %s112_s29, 32  ;;  %p161_p1 = scmp.lt.s32.totalorder %s112_s29, %s112_s29 }
   0x6   :  { %p157_p0 = scmp.ne.s32.totalorder %s112_s29, %s156_s1  ;;  %p162_p2 = scmp.lt.s32.totalorder %s156_s1, %s156_s1 }
   0x8   :  { %148 = vmatpush3.bf16.msra.mxu0 %v147_v7  ;;  %p163_p3 = por %p162_p2, %p161_p1 }
   0x9   :  { %149 = vmatprep.subr.bf16.mxu0 %v180_v3 }
   0xa   :  { %p164_p4 = pnand %p163_p3, %p157_p0 }
   0xc   :  { %151 = vmatpush3.bf16.msra.mxu0 %v150_v10 }
   0xf   :  { %141 = vmatmul.mubr.msk.f32.vlgmr.msra.gmra.mrb[0].mxu0 %vm29_vm1, %v15_v11 }
  0xe2   :  { %v99_v13 = vpop.f32.mrb[0].mxu0 }
  0xe3   :  { %v100_v14 = vadd.f32 %v119_v12, %v99_v13  ;;  %v142_v15 = vpop.f32.mrb[1].mxu0 }
  0xe5   :  { %104 = vst.msk [vmem:[#allocation2] sm:$0x3] %vm103_vm2, %v100_v14 }
  0xe6   :  { %167 = shalt.err (!%p164_p4)
}
  0xe7   :  { %s168_s4 = scalar_lea.hbm %s243_s3, 32 }
  0xe8   :  { %p169_p5 = scmp.ne.s32.totalorder %s243_s3, %s168_s4  ;;  %p172_p6 = scmp.lt.u32.totalorder %s168_s4, %s243_s3 }
  0xea   :  { %p174_p7 = pnand %p172_p6, %p169_p5 }
  0xec   :  { %177 = shalt.err (!%p174_p7)
}
  0xed   :  { %114 = dma.vmem_to_hbm [thread:$0]  %s112_s29, 32, %s243_s3, [#allocation3]  }
  0xee   :  { %178 = dma.done.wait [#allocation3], 32  }
  0xef   :  { %179 = vsyncadd [#allocation3], 4294967264 }
  0xf0   :  { %118 = vsyncpa [#allocation3], 1 }

</bundles_post_ra>
